<compile_context>
chip_gen: v7x
topology: tpu7x:2x2x1
jax: 0.10.0
libtpu: 0.0.40
codegen_flags: <defaults>
</compile_context>

<pallas_src>
import jax
import jax.numpy as jnp
from jax.experimental import pallas as pl
from jax.experimental.pallas import tpu as pltpu


def _round_up(n, m):
    return ((n + m - 1) // m) * m


# ----------------------------- kernels --------------------------------------


def _shared_train_kernel(x_ref, w1_ref, b1_ref, w2m1_ref, b2m1_ref,
                         w2m2_ref, b2m2_ref, o_ref):
    # x_ref:   (TB, D_in)   raw input dtype -> cast to compute dtype in-kernel
    # w1_ref:  (D_in, H)    shared fc1 weight (compute dtype), VMEM-resident
    # b1_ref:  (1, H)       shared fc1 bias (f32)
    # w2m*:    (H, D_out)   per-model fc2 weight (compute dtype), VMEM-resident
    # b2m*:    (1, D_out)   per-model fc2 bias (f32)
    # o_ref:   (TB, D_out)
    xc = x_ref[...].astype(w1_ref.dtype)          # VPU cast, hidden under MXU slack
    h = jnp.dot(xc, w1_ref[...], preferred_element_type=jnp.float32)
    h = jnp.maximum(h + b1_ref[...], 0.0)         # f32 bias + ReLU (v5e fast path)
    h = h.astype(w2m1_ref.dtype)

    # Tiles [0, nt/2) are model1 rows, [nt/2, nt) are model2 rows (padded halves).
    is_m1 = pl.program_id(0) < (pl.num_programs(0) // 2)

    @pl.when(is_m1)
    def _():
        y = jnp.dot(h, w2m1_ref[...],
                    preferred_element_type=jnp.float32) + b2m1_ref[...]
        o_ref[...] = y.astype(o_ref.dtype)

    @pl.when(jnp.logical_not(is_m1))
    def _():
        y = jnp.dot(h, w2m2_ref[...],
                    preferred_element_type=jnp.float32) + b2m2_ref[...]
        o_ref[...] = y.astype(o_ref.dtype)


def _eval_kernel(x_ref, w1_ref, b1_ref, w2_ref, b2_ref, o_ref):
    # Eval mode: model2 applied to every batch tile.
    xc = x_ref[...].astype(w1_ref.dtype)
    h = jnp.dot(xc, w1_ref[...], preferred_element_type=jnp.float32)
    h = jnp.maximum(h + b1_ref[...], 0.0)
    h = h.astype(w2_ref.dtype)
    y = jnp.dot(h, w2_ref[...], preferred_element_type=jnp.float32) + b2_ref[...]
    o_ref[...] = y.astype(o_ref.dtype)


# ----------------------------- wrapper ---------------------------------------


def prepare_params(params, compute_dtype=jnp.bfloat16):
    """One-time cast of MXU operands (weights) to the compute dtype.

    Biases stay f32 — they are added to the f32 MXU accumulator. Call this once
    at parameter-creation time, NOT per forward (avoids a read+write HBM pass of
    every weight on every call).
    """
    return {
        "w1": params["w1"].astype(compute_dtype),
        "b1": params["b1"].astype(jnp.float32),
        "w2_m1": params["w2_m1"].astype(compute_dtype),
        "b2_m1": params["b2_m1"].astype(jnp.float32),
        "w2_m2": params["w2_m2"].astype(compute_dtype),
        "b2_m2": params["b2_m2"].astype(jnp.float32),
    }


def shared_model_forward(x, prepared, training=True, *,
                         out_dtype=jnp.float32, max_block_rows=512):
    """SharedModel.forward.

    x: (B, D_in) (B even in training mode); prepared = prepare_params(params).
    """
    B, D_in = x.shape
    w1, b1 = prepared["w1"], prepared["b1"]
    w2_m1, b2_m1 = prepared["w2_m1"], prepared["b2_m1"]
    w2_m2, b2_m2 = prepared["w2_m2"], prepared["b2_m2"]
    H = w1.shape[1]
    D_out = w2_m2.shape[1]

    compute_dtype = w1.dtype
    op_bytes = jnp.dtype(compute_dtype).itemsize
    x_bytes = jnp.dtype(x.dtype).itemsize
    out_bytes = jnp.dtype(out_dtype).itemsize
    # Full sublane tile for f32 rows, full packed vreg for bf16 rows.
    row_align = 16 if compute_dtype == jnp.bfloat16 else 8

    def _vmem_limit(weight_bytes, bias_bytes, tb):
        needed = (weight_bytes + bias_bytes
                  + 2 * tb * D_in * x_bytes            # double-buffered x tiles
                  + 2 * tb * D_out * out_bytes         # double-buffered o tiles
                  + tb * H * (4 + op_bytes)            # h (f32 + compute-dtype copy)
                  + tb * D_out * 4)                    # y accumulator
        return int(min(64 * 1024 * 1024, max(32 * 1024 * 1024, 2 * needed)))

    if training:
        assert B % 2 == 0, "training mode requires an even batch"
        Bh = B // 2
        tb = _round_up(min(max_block_rows, _round_up(Bh, row_align)), row_align)
        Bh_pad = _round_up(Bh, tb)
        if Bh_pad != Bh:
            pad = jnp.zeros((Bh_pad - Bh, D_in), x.dtype)
            xk = jnp.concatenate([x[:Bh], pad, x[Bh:], pad], axis=0)
        else:
            xk = x
        Bp = 2 * Bh_pad
        nt = Bp // tb

        flops = 2 * Bp * D_in * H + 2 * Bp * H * D_out
        bytes_accessed = (Bp * D_in * x_bytes
                          + (D_in * H + 2 * H * D_out) * op_bytes
                          + (H + 2 * D_out) * 4
                          + Bp * D_out * out_bytes)
        vmem_limit = _vmem_limit((D_in * H + 2 * H * D_out) * op_bytes,
                                 (H + 2 * D_out) * 4, tb)

        out = pl.pallas_call(
            _shared_train_kernel,
            out_shape=jax.ShapeDtypeStruct((Bp, D_out), out_dtype),
            grid_spec=pltpu.PrefetchScalarGridSpec(
                num_scalar_prefetch=0,
                grid=(nt,),
                in_specs=[
                    pl.BlockSpec((tb, D_in), lambda i: (i, 0)),   # x tile (streamed)
                    pl.BlockSpec((D_in, H), lambda i: (0, 0)),    # shared fc1 w (resident)
                    pl.BlockSpec((1, H), lambda i: (0, 0)),       # shared fc1 b
                    pl.BlockSpec((H, D_out), lambda i: (0, 0)),   # model1 fc2 w
                    pl.BlockSpec((1, D_out), lambda i: (0, 0)),   # model1 fc2 b
                    pl.BlockSpec((H, D_out), lambda i: (0, 0)),   # model2 fc2 w
                    pl.BlockSpec((1, D_out), lambda i: (0, 0)),   # model2 fc2 b
                ],
                out_specs=pl.BlockSpec((tb, D_out), lambda i: (i, 0)),
            ),
            compiler_params=pltpu.CompilerParams(
                dimension_semantics=("parallel",),
                vmem_limit_bytes=vmem_limit),
            cost_estimate=pl.CostEstimate(
                flops=flops, transcendentals=0, bytes_accessed=bytes_accessed),
        )(xk, w1, b1, w2_m1, b2_m1, w2_m2, b2_m2)

        if Bh_pad != Bh:
            out = jnp.concatenate([out[:Bh], out[Bh_pad:Bh_pad + Bh]], axis=0)
        return out

    # ---------------- eval mode: model2 over the whole batch ----------------
    tb = _round_up(min(max_block_rows, _round_up(B, row_align)), row_align)
    B_pad = _round_up(B, tb)
    if B_pad != B:
        xk = jnp.concatenate(
            [x, jnp.zeros((B_pad - B, D_in), x.dtype)], axis=0)
    else:
        xk = x
    nt = B_pad // tb

    flops = 2 * B_pad * D_in * H + 2 * B_pad * H * D_out
    bytes_accessed = (B_pad * D_in * x_bytes
                      + (D_in * H + H * D_out) * op_bytes
                      + (H + D_out) * 4
                      + B_pad * D_out * out_bytes)
    vmem_limit = _vmem_limit((D_in * H + H * D_out) * op_bytes,
                             (H + D_out) * 4, tb)

    out = pl.pallas_call(
        _eval_kernel,
        out_shape=jax.ShapeDtypeStruct((B_pad, D_out), out_dtype),
        grid_spec=pltpu.PrefetchScalarGridSpec(
            num_scalar_prefetch=0,
            grid=(nt,),
            in_specs=[
                pl.BlockSpec((tb, D_in), lambda i: (i, 0)),
                pl.BlockSpec((D_in, H), lambda i: (0, 0)),
                pl.BlockSpec((1, H), lambda i: (0, 0)),
                pl.BlockSpec((H, D_out), lambda i: (0, 0)),
                pl.BlockSpec((1, D_out), lambda i: (0, 0)),
            ],
            out_specs=pl.BlockSpec((tb, D_out), lambda i: (i, 0)),
        ),
        compiler_params=pltpu.CompilerParams(
            dimension_semantics=("parallel",),
            vmem_limit_bytes=vmem_limit),
        cost_estimate=pl.CostEstimate(
            flops=flops, transcendentals=0, bytes_accessed=bytes_accessed),
    )(xk, w1, b1, w2_m2, b2_m2)
    return out[:B] if B_pad != B else out


# ----------------------------- reference / test ------------------------------


def _reference_forward(x, params, training=True):
    def mlp(xh, w2, b2):
        h = jnp.maximum(xh @ params["w1"] + params["b1"], 0.0)
        return h @ w2 + b2

    if training:
        Bh = x.shape[0] // 2
        y1 = mlp(x[:Bh], params["w2_m1"], params["b2_m1"])
        y2 = mlp(x[Bh:], params["w2_m2"], params["b2_m2"])
        return jnp.concatenate([y1, y2], axis=0)
    return mlp(x, params["w2_m2"], params["b2_m2"])


def make_params(key, d_in, hidden, d_out):
    k1, k2, k3, k4, k5, k6 = jax.random.split(key, 6)
    scale1 = 1.0 / jnp.sqrt(d_in)
    scale2 = 1.0 / jnp.sqrt(hidden)
    return {
        # fc1.* — shared between model1 and model2 (assign_parameter in reference)
        "w1": jax.random.normal(k1, (d_in, hidden), jnp.float32) * scale1,
        "b1": jax.random.normal(k2, (1, hidden), jnp.float32) * scale1,
        # fc2.* — independent per model
        "w2_m1": jax.random.normal(k3, (hidden, d_out), jnp.float32) * scale2,
        "b2_m1": jax.random.normal(k4, (1, d_out), jnp.float32) * scale2,
        "w2_m2": jax.random.normal(k5, (hidden, d_out), jnp.float32) * scale2,
        "b2_m2": jax.random.normal(k6, (1, d_out), jnp.float32) * scale2,
    }


if __name__ == "__main__":
    key = jax.random.PRNGKey(0)
    kx, kp = jax.random.split(key)

    # Lane-dense / MXU-friendly small shapes: feature dims multiples of 128,
    # half-batch a multiple of 16 (full packed bf16 vreg rows).
    B, D_IN, HIDDEN, D_OUT = 32, 128, 128, 128
    x = jax.random.normal(kx, (B, D_IN), jnp.float32)
    params = make_params(kp, D_IN, HIDDEN, D_OUT)
    y_ref_train = _reference_forward(x, params, training=True)
    y_ref_eval = _reference_forward(x, params, training=False)

    # f32 compute path (exact check against the f32 reference).
    p_f32 = prepare_params(params, jnp.float32)
    y = jax.block_until_ready(shared_model_forward(x, p_f32, training=True))
    assert y.shape == (B, D_OUT)
    assert jnp.allclose(y, y_ref_train, atol=1e-4, rtol=1e-4)

    y_eval = jax.block_until_ready(shared_model_forward(x, p_f32, training=False))
    assert jnp.allclose(y_eval, y_ref_eval, atol=1e-4, rtol=1e-4)

    # Default bf16 MXU path (weights pre-cast once; x cast in-kernel; f32 accum).
    p_bf16 = prepare_params(params)  # bf16 by default
    y_bf16 = jax.block_until_ready(shared_model_forward(x, p_bf16, training=True))
    assert jnp.allclose(y_bf16, y_ref_train, atol=0.2, rtol=0.1)
    y_bf16_eval = jax.block_until_ready(
        shared_model_forward(x, p_bf16, training=False))
    assert jnp.allclose(y_bf16_eval, y_ref_eval, atol=0.2, rtol=0.1)

    # Unaligned batch exercises the half-padding path (perf-only padding,
    # semantics identical to the reference split/concat).
    x_odd = x[:20]
    y_odd = jax.block_until_ready(shared_model_forward(x_odd, p_f32, training=True))
    y_odd_ref = _reference_forward(x_odd, params, training=True)
    assert y_odd.shape == (20, D_OUT)
    assert jnp.allclose(y_odd, y_odd_ref, atol=1e-4, rtol=1e-4)

    print("KERNEL_OK")
</pallas_src>

<mosaic_0001>
module attributes {stable_mosaic.version = 11 : i64} {
  func.func @_shared_train_kernel(%arg0: i32, %arg1: memref<16x128xf32, #tpu.memory_space<vmem>>, %arg2: memref<128x128xf32, #tpu.memory_space<vmem>>, %arg3: memref<1x128xf32, #tpu.memory_space<vmem>>, %arg4: memref<128x128xf32, #tpu.memory_space<vmem>>, %arg5: memref<1x128xf32, #tpu.memory_space<vmem>>, %arg6: memref<128x128xf32, #tpu.memory_space<vmem>>, %arg7: memref<1x128xf32, #tpu.memory_space<vmem>>, %arg8: memref<16x128xf32, #tpu.memory_space<vmem>>) attributes {dimension_semantics = [#tpu.dimension_semantics<parallel>], iteration_bounds = array<i64: 2>, scalar_prefetch = 0 : i64, scratch_operands = 0 : i64, tpu.core_type = #tpu.core_type<tc>, window_params = [{transform_indices = @transform_0, window_bounds = array<i64: 16, 128>}, {pipeline_mode = #tpu.pipeline_mode<synchronous>, transform_indices = @transform_1, window_bounds = array<i64: 128, 128>}, {pipeline_mode = #tpu.pipeline_mode<synchronous>, transform_indices = @transform_2, window_bounds = array<i64: 1, 128>}, {pipeline_mode = #tpu.pipeline_mode<synchronous>, transform_indices = @transform_3, window_bounds = array<i64: 128, 128>}, {pipeline_mode = #tpu.pipeline_mode<synchronous>, transform_indices = @transform_4, window_bounds = array<i64: 1, 128>}, {pipeline_mode = #tpu.pipeline_mode<synchronous>, transform_indices = @transform_5, window_bounds = array<i64: 128, 128>}, {pipeline_mode = #tpu.pipeline_mode<synchronous>, transform_indices = @transform_6, window_bounds = array<i64: 1, 128>}, {transform_indices = @transform_7, window_bounds = array<i64: 16, 128>}]} {
    %c0 = arith.constant 0 : index
    %c0_0 = arith.constant 0 : index
    %0 = vector.load %arg1[%c0, %c0_0] : memref<16x128xf32, #tpu.memory_space<vmem>>, vector<16x128xf32>
    %c0_1 = arith.constant 0 : index
    %c0_2 = arith.constant 0 : index
    %1 = vector.load %arg2[%c0_1, %c0_2] : memref<128x128xf32, #tpu.memory_space<vmem>>, vector<128x128xf32>
    %cst = arith.constant dense<0.000000e+00> : vector<16x128xf32>
    %2 = tpu.matmul %0, %1, %cst {dimension_numbers = #tpu.dot_dimension_numbers<[1], [0], [0], [1], [0, 0, 1, 1], [], []>} : vector<16x128xf32>, vector<128x128xf32>, vector<16x128xf32> -> vector<16x128xf32>
    %c0_3 = arith.constant 0 : index
    %c0_4 = arith.constant 0 : index
    %3 = vector.load %arg3[%c0_3, %c0_4] : memref<1x128xf32, #tpu.memory_space<vmem>>, vector<1x128xf32>
    %4 = vector.broadcast %3 : vector<1x128xf32> to vector<16x128xf32>
    %5 = arith.addf %2, %4 : vector<16x128xf32>
    %cst_5 = arith.constant 0.000000e+00 : f32
    %6 = vector.broadcast %cst_5 : f32 to vector<16x128xf32>
    %7 = arith.maximumf %5, %6 : vector<16x128xf32>
    %c1_i32 = arith.constant 1 : i32
    %8 = arith.cmpi slt, %arg0, %c1_i32 : i32
    %9 = arith.extui %8 : i1 to i32
    %c0_i32 = arith.constant 0 : i32
    %10 = arith.cmpi ne, %9, %c0_i32 : i32
    scf.if %10 {
      %c0_7 = arith.constant 0 : index
      %c0_8 = arith.constant 0 : index
      %14 = vector.load %arg4[%c0_7, %c0_8] : memref<128x128xf32, #tpu.memory_space<vmem>>, vector<128x128xf32>
      %cst_9 = arith.constant dense<0.000000e+00> : vector<16x128xf32>
      %15 = tpu.matmul %7, %14, %cst_9 {dimension_numbers = #tpu.dot_dimension_numbers<[1], [0], [0], [1], [0, 0, 1, 1], [], []>} : vector<16x128xf32>, vector<128x128xf32>, vector<16x128xf32> -> vector<16x128xf32>
      %c0_10 = arith.constant 0 : index
      %c0_11 = arith.constant 0 : index
      %16 = vector.load %arg5[%c0_10, %c0_11] : memref<1x128xf32, #tpu.memory_space<vmem>>, vector<1x128xf32>
      %17 = vector.broadcast %16 : vector<1x128xf32> to vector<16x128xf32>
      %18 = arith.addf %15, %17 : vector<16x128xf32>
      %c0_12 = arith.constant 0 : index
      %c0_13 = arith.constant 0 : index
      %19 = vector.load %arg8[%c0_12, %c0_13] : memref<16x128xf32, #tpu.memory_space<vmem>>, vector<16x128xf32>
      tpu.vector_store %arg8[%c0_12, %c0_13], %18 {strides = array<i32>} : memref<16x128xf32, #tpu.memory_space<vmem>>, vector<16x128xf32>,
    } else {
    }
    %true = arith.constant true
    %11 = arith.xori %8, %true : i1
    %12 = arith.extui %11 : i1 to i32
    %c0_i32_6 = arith.constant 0 : i32
    %13 = arith.cmpi ne, %12, %c0_i32_6 : i32
    scf.if %13 {
      %c0_7 = arith.constant 0 : index
      %c0_8 = arith.constant 0 : index
      %14 = vector.load %arg6[%c0_7, %c0_8] : memref<128x128xf32, #tpu.memory_space<vmem>>, vector<128x128xf32>
      %cst_9 = arith.constant dense<0.000000e+00> : vector<16x128xf32>
      %15 = tpu.matmul %7, %14, %cst_9 {dimension_numbers = #tpu.dot_dimension_numbers<[1], [0], [0], [1], [0, 0, 1, 1], [], []>} : vector<16x128xf32>, vector<128x128xf32>, vector<16x128xf32> -> vector<16x128xf32>
      %c0_10 = arith.constant 0 : index
      %c0_11 = arith.constant 0 : index
      %16 = vector.load %arg7[%c0_10, %c0_11] : memref<1x128xf32, #tpu.memory_space<vmem>>, vector<1x128xf32>
      %17 = vector.broadcast %16 : vector<1x128xf32> to vector<16x128xf32>
      %18 = arith.addf %15, %17 : vector<16x128xf32>
      %c0_12 = arith.constant 0 : index
      %c0_13 = arith.constant 0 : index
      %19 = vector.load %arg8[%c0_12, %c0_13] : memref<16x128xf32, #tpu.memory_space<vmem>>, vector<16x128xf32>
      tpu.vector_store %arg8[%c0_12, %c0_13], %18 {strides = array<i32>} : memref<16x128xf32, #tpu.memory_space<vmem>>, vector<16x128xf32>,
    } else {
    }
    return
  }
  func.func @transform_0(%arg0: i32) -> (i32, i32) {
    %c0_i32 = arith.constant 0 : i32
    %c0_i32_0 = arith.constant 0 : i32
    return %arg0, %c0_i32 : i32, i32
  }
  func.func @transform_1(%arg0: i32) -> (i32, i32) {
    %c0_i32 = arith.constant 0 : i32
    %c0_i32_0 = arith.constant 0 : i32
    %c0_i32_1 = arith.constant 0 : i32
    return %c0_i32, %c0_i32_0 : i32, i32
  }
  func.func @transform_2(%arg0: i32) -> (i32, i32) {
    %c0_i32 = arith.constant 0 : i32
    %c0_i32_0 = arith.constant 0 : i32
    %c0_i32_1 = arith.constant 0 : i32
    return %c0_i32, %c0_i32_0 : i32, i32
  }
  func.func @transform_3(%arg0: i32) -> (i32, i32) {
    %c0_i32 = arith.constant 0 : i32
    %c0_i32_0 = arith.constant 0 : i32
    %c0_i32_1 = arith.constant 0 : i32
    return %c0_i32, %c0_i32_0 : i32, i32
  }
  func.func @transform_4(%arg0: i32) -> (i32, i32) {
    %c0_i32 = arith.constant 0 : i32
    %c0_i32_0 = arith.constant 0 : i32
    %c0_i32_1 = arith.constant 0 : i32
    return %c0_i32, %c0_i32_0 : i32, i32
  }
  func.func @transform_5(%arg0: i32) -> (i32, i32) {
    %c0_i32 = arith.constant 0 : i32
    %c0_i32_0 = arith.constant 0 : i32
    %c0_i32_1 = arith.constant 0 : i32
    return %c0_i32, %c0_i32_0 : i32, i32
  }
  func.func @transform_6(%arg0: i32) -> (i32, i32) {
    %c0_i32 = arith.constant 0 : i32
    %c0_i32_0 = arith.constant 0 : i32
    %c0_i32_1 = arith.constant 0 : i32
    return %c0_i32, %c0_i32_0 : i32, i32
  }
  func.func @transform_7(%arg0: i32) -> (i32, i32) {
    %c0_i32 = arith.constant 0 : i32
    %c0_i32_0 = arith.constant 0 : i32
    return %arg0, %c0_i32 : i32, i32
  }
}

</mosaic_0001>

<bundles_post_ra>
// kernel: tpu_custom_call.1
= control target key start
LH: loop header
LB: loop body
LE: loop exit
PB: predicated region body
PF: predicated region fallthrough
CT: control target
= control target key end

     0   :  { %12 = vsyncpa [#allocation3], 0  ;;  %s1675_s0 = inlined_call_operand.hbm [shape: f32[32,128], index: 0, kind: input, shape index: {}]   ;;  %s1676_s1 = inlined_call_operand.hbm [shape: f32[128,128], index: 1, kind: input, shape index: {}]   ;;  %s1677_s2 = inlined_call_operand.vmem [shape: f32[1,128], index: 2, kind: input, shape index: {}]   ;;  %s1678_s3 = inlined_call_operand.hbm [shape: f32[128,128], index: 3, kind: input, shape index: {}]   ;;  %s1679_s4 = inlined_call_operand.vmem [shape: f32[1,128], index: 4, kind: input, shape index: {}]   ;;  %s1680_s5 = inlined_call_operand.hbm [shape: f32[128,128], index: 5, kind: input, shape index: {}]   ;;  %s1681_s6 = inlined_call_operand.vmem [shape: f32[1,128], index: 6, kind: input, shape index: {}]   ;;  %s1682_s7 = inlined_call_operand.hbm [shape: f32[32,128], index: 7, kind: output, shape index: {}]  }
   0x1   :  { %14 = vsyncpa [#allocation3 + $0x1], 0 }
   0x2   :  { %15 = vsyncpa [#allocation6], 0 }
   0x3   :  { %16 = vsyncpa [#allocation9], 0 }
   0x4   :  { %17 = vsyncpa [#allocation4], 0 }
   0x5   :  { %19 = vsyncpa [#allocation4 + $0x1], 0  ;;  %s1371_s24 = smov 0   ;;  %s1373_s25 = smov 0  }
   0x6   :  { %s1375_s26 = smov 0   ;;  %s1377_s27 = smov 0  }
   0x7 LB: > { %s1392_s28 = sadd.s32 4294967295, %s1320_s27   ;;  %s769_s29 = sadd.s32 4294967294, %s1320_s27   ;;  %s1320_s27 = sphi %s1377_s27, %s1708_s27   ;;  %s1316_s26 = sphi %s1375_s26, %s1707_s26   ;;  %s1312_s25 = sphi %s1373_s25, %s1706_s25   ;;  %s1308_s24 = sphi %s1371_s24, %s1705_s24  }
   0x8   : > { %p45_p0 = scmp.ne.s32.totalorder %s1312_s25, %s1308_s24  ;;  %p1683_p1 = scmp.eq.s32.totalorder %s1392_s28, 0 }
   0x9   : > { %p201_p3 = scmp.eq.s32.totalorder %s769_s29, 1  ;;  %p770_p5 = scmp.ge.s32.totalorder %s1320_s27, 1 }
   0xa   : > { %p1401_p4 = por %p1683_p1, %p45_p0  ;;  %p208_p7 = scmp.lt.s32.totalorder %s1320_s27, 3 }
   0xb   : > { %p1406_p6 = por %p201_p3, %p45_p0  ;;  %s1322_s10 = smov [#allocation5]  }
   0xc   : > { %s1687_s30 = scalar_select %p1401_p4, 1, 0 }
   0xd   : > { %s1688_s8 = scalar_select %p1406_p6, 1, 0 }
   0xe   : > { %p1411_p8 = pnand %p770_p5, %p208_p7  ;;  %s220_s11 = sshll.u32 %s1322_s10, 4  ;;  %s1415_s11 = int_to_ptr.vmem [resolvable:$true] %s220_s11 }
   0xf   : > { %1689 = sst [smem:[#allocation15_spill]] %s1688_s8  ;;  %s1323_s13 = smov [#allocation7]  }
  0x10   : > { %s1690_s9 = scalar_select %p1411_p8, 1, 0 }
  0x11   : > { %p1067_p9 = pneg %p1411_p8  ;;  %s236_s14 = sshll.u32 %s1323_s13, 4  ;;  %s1426_s14 = int_to_ptr.vmem [resolvable:$true] %s236_s14 }
  0x12   : > { %s1324_s15 = smov [#allocation8]   ;;  %s1132_s19 = scalar_lea.hbm %s1676_s1, 2048 }
  0x13   : > { %p1422_p11 = pnand %p1067_p9, %p1683_p1  ;;  %s1428_s16 = sshll.u32 %s1324_s15, 4  ;;  %s253_s16 = int_to_ptr.vmem [resolvable:$true] %s1428_s16 }
  0x14   : > { %p1133_p12 = scmp.ne.s32.totalorder %s1676_s1, %s1132_s19  ;;  %p1139_p5 = scmp.lt.u32.totalorder %s1132_s19, %s1676_s1 }
  0x15   : > { %p1438_p13 = pneg %p1422_p11 }
  0x17   : > { %p1135_p0 = pnand %p1438_p13, %p1133_p12 }
  0x19   : > { %p1136_p3 = pneg %p1135_p0 }
  0x1b   : > { %p1141_p7 = pnand %p1139_p5, %p1136_p3 }
  0x1d   : > { %1144 = shalt.err (!%p1141_p7)
}
  0x1e   : > { %s1145_s10 = scalar_lea.vmem %s1415_s11, 2048  ;;  %p1153_p2 = scmp.lt.s32.totalorder %s1415_s11, %s1415_s11 }
  0x1f   : > { %p1146_p9 = scmp.ne.s32.totalorder %s1415_s11, %s1145_s10  ;;  %p1154_p6 = scmp.lt.s32.totalorder %s1145_s10, %s1145_s10 }
  0x21   : > { %p1148_p10 = pnand %p1146_p9, %p1438_p13  ;;  %p1155_p12 = por %p1154_p6, %p1153_p2 }
  0x23   : > { %p1149_p1 = pneg %p1148_p10 }
  0x25   : > { %p1156_p0 = pnand %p1155_p12, %p1149_p1 }
  0x27   : > { %1159 = shalt.err (!%p1156_p0)
}
  0x28   : > { %s1325_s13 = smov 128   ;;  %s1326_s15 = smov 8  }
  0x29   : > { %1070 = dma.hbm_to_vmem [thread:$0]  (!%p1422_p11), %s1676_s1, 2048, %s1415_s11, [#allocation6], %s1325_s13, %s1325_s13, %s1326_s15  }
  0x2a   : > { %s1160_s21 = scalar_lea.hbm %s1678_s3, 2048 }
  0x2b   : > { %p1161_p1 = scmp.ne.s32.totalorder %s1678_s3, %s1160_s21  ;;  %p1167_p10 = scmp.lt.u32.totalorder %s1160_s21, %s1678_s3 }
  0x2d   : > { %p1163_p2 = pnand %p1161_p1, %p1438_p13 }
  0x2f   : > { %p1164_p6 = pneg %p1163_p2 }
  0x31   : > { %p1169_p3 = pnand %p1167_p10, %p1164_p6 }
  0x33   : > { %1172 = shalt.err (!%p1169_p3)
}
  0x34   : > { %s1173_s11 = scalar_lea.vmem %s1426_s14, 2048  ;;  %p1181_p12 = scmp.lt.s32.totalorder %s1426_s14, %s1426_s14 }
  0x35   : > { %p1174_p5 = scmp.ne.s32.totalorder %s1426_s14, %s1173_s11  ;;  %p1182_p0 = scmp.lt.s32.totalorder %s1173_s11, %s1173_s11 }
  0x37   : > { %p1176_p7 = pnand %p1174_p5, %p1438_p13  ;;  %p1183_p1 = por %p1182_p0, %p1181_p12 }
  0x39   : > { %p1177_p9 = pneg %p1176_p7 }
  0x3b   : > { %p1184_p2 = pnand %p1183_p1, %p1177_p9 }
  0x3d   : > { %1187 = shalt.err (!%p1184_p2)
}
  0x3e   : > { %1073 = dma.hbm_to_vmem [thread:$0]  (!%p1422_p11), %s1678_s3, 2048, %s1426_s14, [#allocation6], %s1325_s13, %s1325_s13, %s1326_s15  }
  0x3f   : > { %s1188_s20 = scalar_lea.hbm %s1680_s5, 2048 }
  0x40   : > { %p1189_p6 = scmp.ne.s32.totalorder %s1680_s5, %s1188_s20  ;;  %p1195_p5 = scmp.lt.u32.totalorder %s1188_s20, %s1680_s5 }
  0x42   : > { %p1191_p10 = pnand %p1189_p6, %p1438_p13 }
  0x44   : > { %p1192_p3 = pneg %p1191_p10 }
  0x46   : > { %p1197_p7 = pnand %p1195_p5, %p1192_p3 }
  0x48   : > { %1200 = shalt.err (!%p1197_p7)
}
  0x49   : > { %s1201_s11 = scalar_lea.vmem %s253_s16, 2048  ;;  %p1209_p1 = scmp.lt.s32.totalorder %s253_s16, %s253_s16 }
  0x4a   : > { %p1202_p9 = scmp.ne.s32.totalorder %s253_s16, %s1201_s11  ;;  %p1210_p2 = scmp.lt.s32.totalorder %s1201_s11, %s1201_s11 }
  0x4c   : > { %p1204_p12 = pnand %p1202_p9, %p1438_p13  ;;  %p1211_p4 = por %p1210_p2, %p1209_p1 }
  0x4e   : > { %p1205_p0 = pneg %p1204_p12 }
  0x50   : > { %p1212_p8 = pnand %p1211_p4, %p1205_p0 }
  0x52   : > { %1215 = shalt.err (!%p1212_p8)
}
  0x53   : > { %1076 = dma.hbm_to_vmem [thread:$0]  (!%p1422_p11), %s1680_s5, 2048, %s253_s16, [#allocation9], %s1325_s13, %s1325_s13, %s1326_s15  }
  0x54   : > { %s1511_s22 = sadd.s32 1, %s1320_s27   ;;  %s32_s17 = sadd.s32 1, %s1316_s26 }
  0x55   : > { %s29_s12 = ssub.s32 %s1320_s27, %s1511_s22  ;;  %p39_p8 = scmp.ne.s32.totalorder %s1316_s26, %s1312_s25 }
  0x56   : > { %p30_p4 = scmp.eq.s32.totalorder %s29_s12, 0  ;;  %p40_p13 = scmp.eq.s32.totalorder %s1320_s27, 0 }
  0x57   : > { %p1088_p6 = scmp.lt.s32.totalorder %s1320_s27, 2  ;;  %p1693_p3 = scmp.eq.s32.totalorder %s1392_s28, 1 }
  0x58   : > { %s1521_s18 = scalar_select %p30_p4, %s1316_s26, %s32_s17  }
  0x59   : > { %p41_p10 = por %p40_p13, %p39_p8  ;;  %p1525_p5 = por %p1693_p3, %p39_p8 }
  0x5a   : > { %s269_s20 = sand.u32 1, %s1316_s26   ;;  %s794_s21 = sshll.u32 %s1320_s27, 8 }
  0x5b   : > { %s775_s16 = sshll.u32 %s269_s20, 4  ;;  %s1534_s10 = scalar_lea.hbm %s1675_s0, %s794_s21 }
  0x5c   : > { %s273_s11 = scalar_lea.vmem [#allocation2], %s775_s16  ;;  %p1536_p11 = pnand %p1088_p6, %p41_p10 }
  0x5d   : > { %s280_s14 = sshll.u32 %s273_s11, 4  ;;  %s1542_s12 = scalar_lea.sflag [#allocation3], %s269_s20  ;;  %s1540_s14 = int_to_ptr.vmem [resolvable:$true] %s280_s14 }
  0x5e   : > { %s1216_s17 = scalar_lea.hbm %s1534_s10, 256  ;;  %p1218_p9 = pneg %p1536_p11 }
  0x5f   : > { %p1217_p7 = scmp.ne.s32.totalorder %s1534_s10, %s1216_s17  ;;  %s1221_s23 = scalar_lea.hbm %s1675_s0, 512 }
  0x60   : > { %p1222_p1 = scmp.lt.u32.totalorder %s1534_s10, %s1675_s0  ;;  %p1223_p2 = scmp.lt.u32.totalorder %s1221_s23, %s1216_s17 }
  0x61   : > { %p1219_p12 = pnand %p1218_p9, %p1217_p7  ;;  %p1225_p8 = scmp.lt.u32.totalorder %s1216_s17, %s1534_s10 }
  0x62   : > { %p1224_p4 = por %p1223_p2, %p1222_p1 }
  0x63   : > { %p1220_p0 = pneg %p1219_p12 }
  0x64   : > { %p1226_p13 = por %p1225_p8, %p1224_p4 }
  0x66   : > { %p1227_p6 = pnand %p1226_p13, %p1220_p0 }
  0x68   : > { %1230 = shalt.err (!%p1227_p6)
}
  0x69   : > { %s1231_s20 = scalar_lea.vmem %s1540_s14, 256  ;;  %s1327_s21 = smov [#allocation2]  }
  0x6a   : > { %p1232_p10 = scmp.ne.s32.totalorder %s1540_s14, %s1231_s20  ;;  %s1236_s16 = sshll.u32 %s1327_s21, 4  ;;  %s1237_s16 = int_to_ptr.vmem [resolvable:$false] %s1236_s16 }
  0x6b   : > { %s1238_s29 = scalar_lea.vmem %s1237_s16, 512  ;;  %p1239_p12 = scmp.lt.s32.totalorder %s1540_s14, %s1237_s16 }
  0x6c   : > { %p1234_p3 = pnand %p1232_p10, %p1218_p9  ;;  %p1240_p1 = scmp.lt.s32.totalorder %s1238_s29, %s1231_s20 }
  0x6e   : > { %p1235_p7 = pneg %p1234_p3  ;;  %p1241_p2 = por %p1240_p1, %p1239_p12 }
  0x70   : > { %p1242_p4 = pnand %p1241_p2, %p1235_p7 }
  0x72   : > { %1245 = shalt.err (!%p1242_p4)
}
  0x73   : > { %1080 = dma.hbm_to_vmem [thread:$0]  (!%p1536_p11), %s1534_s10, 256, %s1540_s14, %s1542_s12, %s1325_s13, %s1325_s13, %s1326_s15  }
  0x74   : > { %p1696_p9 = scmp.ne.s32.totalorder %s1690_s9, 0 }
  0x75   : > { %s1576_s17 = sand.u32 (!%p1696_p9), 1, %s1312_s25   ;;  %p1697_p0 = scmp.ne.s32.totalorder (!%p1696_p9), %s1687_s30, 0 }
  0x76   : > { %292 = sbr.rel (%p1696_p9) target bundleno = 879 (0x36f), region = 48  ;;  %s779_s23 = sshll.u32 (!%p1696_p9), %s1576_s17, 4 }
  0x77   : > { %s295_s11 = scalar_lea.sflag (!%p1696_p9), [#allocation3], %s1576_s17  ;;  %s1582_s8 = scalar_lea.vmem (!%p1696_p9), [#allocation2], %s779_s23 }
  0x7d   : > { %1291 = dma.done.wait (%p1697_p0), %s295_s11, 256  }
  0x7e   : > { %1293 = vsyncadd (%p1697_p0), %s295_s11, 4294967040  ;;  %p1698_p11 = scmp.eq.s32.totalorder %s1392_s28, 0 }
  0x80   : > { %1295 = dma.done.wait (%p1698_p11), [#allocation6], 4096   ;;  %p1699_p8 = pmov %p1698_p11 }
  0x82   : > { %1297 = vsyncadd (%p1699_p8), [#allocation6], 4294963200  ;;  %p1700_p13 = pmov %p1699_p8 }
  0x83   : > { %p1701_p6 = pmov %p1699_p8 }
  0x84   : > { %1299 = dma.done.wait (%p1700_p13), [#allocation9], 2048  }
  0x85   : > { %1301 = vsyncadd (%p1701_p6), [#allocation9], 4294965248  ;;  %v345_v0 = vld [vmem:[#allocation5] sm:$0xff]  ;;  %v346_v1 = vld [vmem:[#allocation5 + $0x8] sm:$0xff]  ;;  %s1606_s13 = scalar_lea.vmem [#allocation10], %s779_s23  ;;  %p785_p10 = scmp.ge.s32.totalorder %s1392_s28, 1 }
  0x86   : > { %v347_v2 = vld [vmem:[#allocation5 + $0x10] sm:$0xff]  ;;  %v955_v3 = vpack.c.bf16 %v346_v1, %v345_v0  ;;  %v348_v4 = vld [vmem:[#allocation5 + $0x18] sm:$0xff]  ;;  %v349_v6 = vld [vmem:[#allocation5 + $0x20] sm:$0xff] }
  0x87   : > { %v959_v5 = vpack.c.bf16 %v348_v4, %v347_v2  ;;  %v350_v7 = vld [vmem:[#allocation5 + $0x28] sm:$0xff]  ;;  %v343_v9 = vld [vmem:[%s1582_s8] sm:$0xff]  ;;  %v352_v11 = vld [vmem:[#allocation5 + $0x38] sm:$0xff] }
  0x88   : > { %956 = vmatprep.subr.bf16.mxu0 %v955_v3  ;;  %v963_v8 = vpack.c.bf16 %v350_v7, %v349_v6  ;;  %v351_v10 = vld [vmem:[#allocation5 + $0x30] sm:$0xff]  ;;  %882 = vmatprep.mubr.f32.mxu0 %v343_v9  ;;  %v353_v13 = vld [vmem:[#allocation5 + $0x40] sm:$0xff]  ;;  %v354_v14 = vld [vmem:[#allocation5 + $0x48] sm:$0xff] }
  0x89   : > { %958 = vmatpush3.bf16.msra.mxu0 %v955_v3  ;;  %v967_v12 = vpack.c.bf16 %v352_v11, %v351_v10  ;;  %v971_v15 = vpack.c.bf16 %v354_v14, %v353_v13  ;;  %v355_v16 = vld [vmem:[#allocation5 + $0x50] sm:$0xff]  ;;  %v356_v17 = vld [vmem:[#allocation5 + $0x58] sm:$0xff]  ;;  %v357_v19 = vld [vmem:[#allocation5 + $0x60] sm:$0xff] }
  0x8a   : > { %960 = vmatprep.subr.bf16.mxu0 %v959_v5  ;;  %v975_v18 = vpack.c.bf16 %v356_v17, %v355_v16  ;;  %v358_v20 = vld [vmem:[#allocation5 + $0x68] sm:$0xff]  ;;  %v359_v22 = vld [vmem:[#allocation5 + $0x70] sm:$0xff]  ;;  %v360_v23 = vld [vmem:[#allocation5 + $0x78] sm:$0xff] }
  0x8b   : > { %v979_v21 = vpack.c.bf16 %v358_v20, %v357_v19  ;;  %v983_v24 = vpack.c.bf16 %v360_v23, %v359_v22  ;;  %v344_v25 = vld [vmem:[%s1582_s8 + $0x8] sm:$0xff]  ;;  %v784_v26 = vld [vmem:[%s1677_s2] ss:$0 sm:$0xff]  ;;  %v451_v35 = vld [vmem:[#allocation7 + $0x10] sm:$0xff] (!%p785_p10) }
  0x8c   : > { %v449_v33 = vld [vmem:[#allocation7] sm:$0xff] (!%p785_p10)  ;;  %v450_v34 = vld [vmem:[#allocation7 + $0x8] sm:$0xff] (!%p785_p10)  ;;  %v452_v37 = vld [vmem:[#allocation7 + $0x18] sm:$0xff] (!%p785_p10) }
  0x8d   : > { %962 = vmatpush3.bf16.msra.mxu0 %v959_v5  ;;  %v987_v36 = vpack.c.bf16 (!%p785_p10), %v450_v34, %v449_v33  ;;  %v991_v38 = vpack.c.bf16 (!%p785_p10), %v452_v37, %v451_v35  ;;  %v453_v39 = vld [vmem:[#allocation7 + $0x20] sm:$0xff] (!%p785_p10)  ;;  %v454_v40 = vld [vmem:[#allocation7 + $0x28] sm:$0xff] (!%p785_p10)  ;;  %v455_v42 = vld [vmem:[#allocation7 + $0x30] sm:$0xff] (!%p785_p10) }
  0x8e   : > { %964 = vmatprep.subr.bf16.mxu0 %v963_v8  ;;  %v995_v41 = vpack.c.bf16 (!%p785_p10), %v454_v40, %v453_v39  ;;  %v456_v43 = vld [vmem:[#allocation7 + $0x38] sm:$0xff] (!%p785_p10)  ;;  %v457_v45 = vld [vmem:[#allocation7 + $0x40] sm:$0xff] (!%p785_p10)  ;;  %v458_v46 = vld [vmem:[#allocation7 + $0x48] sm:$0xff] (!%p785_p10) }
  0x8f   : > { %v999_v44 = vpack.c.bf16 (!%p785_p10), %v456_v43, %v455_v42  ;;  %v1003_v47 = vpack.c.bf16 (!%p785_p10), %v458_v46, %v457_v45  ;;  %v459_v48 = vld [vmem:[#allocation7 + $0x50] sm:$0xff] (!%p785_p10)  ;;  %v460_v49 = vld [vmem:[#allocation7 + $0x58] sm:$0xff] (!%p785_p10)  ;;  %v461_v51 = vld [vmem:[#allocation7 + $0x60] sm:$0xff] (!%p785_p10) }
  0x90   : > { %v1007_v50 = vpack.c.bf16 (!%p785_p10), %v460_v49, %v459_v48  ;;  %v462_v52 = vld [vmem:[#allocation7 + $0x68] sm:$0xff] (!%p785_p10)  ;;  %v463_v54 = vld [vmem:[#allocation7 + $0x70] sm:$0xff] (!%p785_p10)  ;;  %v464_v55 = vld [vmem:[#allocation7 + $0x78] sm:$0xff] (!%p785_p10) }
  0x91   : > { %966 = vmatpush3.bf16.msra.mxu0 %v963_v8  ;;  %v1011_v53 = vpack.c.bf16 (!%p785_p10), %v462_v52, %v461_v51  ;;  %v1015_v56 = vpack.c.bf16 (!%p785_p10), %v464_v55, %v463_v54  ;;  %v786_v57 = vld [vmem:[%s1679_s4] ss:$0 sm:$0xff] (!%p785_p10) }
  0x92   : > { %968 = vmatprep.subr.bf16.mxu0 %v967_v12 }
  0x95   : > { %970 = vmatpush3.bf16.msra.mxu0 %v967_v12 }
  0x96   : > { %972 = vmatprep.subr.bf16.mxu0 %v971_v15 }
  0x99   : > { %974 = vmatpush3.bf16.msra.mxu0 %v971_v15 }
  0x9a   : > { %976 = vmatprep.subr.bf16.mxu0 %v975_v18 }
  0x9d   : > { %978 = vmatpush3.bf16.msra.mxu0 %v975_v18 }
  0x9e   : > { %980 = vmatprep.subr.bf16.mxu0 %v979_v21 }
  0xa1   : > { %982 = vmatpush3.bf16.msra.mxu0 %v979_v21 }
  0xa2   : > { %984 = vmatprep.subr.bf16.mxu0 %v983_v24 }
  0xa5   : > { %986 = vmatpush3.bf16.msra.mxu0 %v983_v24 }
  0xa6   : > { %988 = vmatprep.subr.bf16.mxu0 (!%p785_p10), %v987_v36 }
  0xa8   : > { %883 = vmatmul.mubr.f32.vlgmr.msra.gmra.mrb[0].mxu0 %v344_v25 }
  0xa9   : > { %990 = vmatpush3.bf16.msra.mxu0 (!%p785_p10), %v987_v36 }
  0xaa   : > { %992 = vmatprep.subr.bf16.mxu0 (!%p785_p10), %v991_v38 }
  0xad   : > { %994 = vmatpush3.bf16.msra.mxu0 (!%p785_p10), %v991_v38 }
  0xae   : > { %996 = vmatprep.subr.bf16.mxu0 (!%p785_p10), %v995_v41 }
  0xb1   : > { %998 = vmatpush3.bf16.msra.mxu0 (!%p785_p10), %v995_v41 }
  0xb2   : > { %1000 = vmatprep.subr.bf16.mxu0 (!%p785_p10), %v999_v44 }
  0xb5   : > { %1002 = vmatpush3.bf16.msra.mxu0 (!%p785_p10), %v999_v44 }
  0xb6   : > { %1004 = vmatprep.subr.bf16.mxu0 (!%p785_p10), %v1003_v47 }
  0xb9   : > { %1006 = vmatpush3.bf16.msra.mxu0 (!%p785_p10), %v1003_v47 }
  0xba   : > { %1008 = vmatprep.subr.bf16.mxu0 (!%p785_p10), %v1007_v50 }
  0xbd   : > { %1010 = vmatpush3.bf16.msra.mxu0 (!%p785_p10), %v1007_v50 }
  0xbe   : > { %1012 = vmatprep.subr.bf16.mxu0 (!%p785_p10), %v1011_v53 }
  0xc1   : > { %1014 = vmatpush3.bf16.msra.mxu0 (!%p785_p10), %v1011_v53 }
  0xc2   : > { %1016 = vmatprep.subr.bf16.mxu0 (!%p785_p10), %v1015_v56 }
  0xc5   : > { %1018 = vmatpush3.bf16.msra.mxu0 (!%p785_p10), %v1015_v56 }
 0x179   : > { %448 = sbr.rel (%p785_p10) target bundleno = 602 (0x25a), region = 68 }
 0x17b   : > { %v884_v27 = vpop.f32.mrb[0].mxu0 }
 0x17c   : > { %v1601_v28 = vadd.f32 %v884_v27, %v784_v26  ;;  %v434_v29 = vpop.f32.mrb[1].mxu0 }
 0x17d   : > { %v435_v30 = vadd.f32 %v784_v26, %v434_v29 }
 0x17e   : > { %v444_v31 = vmax.f32 %v1601_v28, 0.0 }
 0x17f   : > { %v443_v32 = vmax.f32 %v435_v30, 0.0 }
 0x181   : > { %917 = vmatprep.mubr.f32.mxu0 %v443_v32 }
 0x182   : > { %918 = vmatmul.mubr.f32.vlgmr.msra.gmra.mrb[0].mxu0 %v444_v31 }
 0x255   : > { %v919_v58 = vpop.f32.mrb[0].mxu0 }
 0x256   : > { %v544_v59 = vadd.f32 %v919_v58, %v786_v57  ;;  %v538_v60 = vpop.f32.mrb[1].mxu0 }
 0x257   : > { %v539_v61 = vadd.f32 %v786_v57, %v538_v60 }
 0x258   : > { %548 = vst [vmem:[%s1606_s13 + $0x8] sm:$0xff] %v544_v59 }
 0x259   : > { %547 = vst [vmem:[%s1606_s13] sm:$0xff] %v539_v61 }
 0x25a PF: > { %p787_p3 = scmp.lt.s32.totalorder %s1392_s28, 1 }
 0x25b   : > { %v553_v62 = vld [vmem:[#allocation8] sm:$0xff] (!%p787_p3)  ;;  %v554_v63 = vld [vmem:[#allocation8 + $0x8] sm:$0xff] (!%p787_p3)  ;;  %v555_v0 = vld [vmem:[#allocation8 + $0x10] sm:$0xff] (!%p787_p3)  ;;  %952 = vmatprep.mubr.f32.mxu0 (!%p787_p3), %v443_v32 }
 0x25c   : > { %552 = sbr.rel (%p787_p3) target bundleno = 854 (0x356), region = 72  ;;  %v1019_v1 = vpack.c.bf16 (!%p787_p3), %v554_v63, %v553_v62  ;;  %v556_v2 = vld [vmem:[#allocation8 + $0x18] sm:$0xff] (!%p787_p3)  ;;  %v557_v4 = vld [vmem:[#allocation8 + $0x20] sm:$0xff] (!%p787_p3)  ;;  %v558_v5 = vld [vmem:[#allocation8 + $0x28] sm:$0xff] (!%p787_p3) }
 0x25d   : > { %v1023_v3 = vpack.c.bf16 (!%p787_p3), %v556_v2, %v555_v0  ;;  %v1027_v6 = vpack.c.bf16 (!%p787_p3), %v558_v5, %v557_v4  ;;  %v559_v7 = vld [vmem:[#allocation8 + $0x30] sm:$0xff] (!%p787_p3)  ;;  %v560_v8 = vld [vmem:[#allocation8 + $0x38] sm:$0xff] (!%p787_p3)  ;;  %v561_v10 = vld [vmem:[#allocation8 + $0x40] sm:$0xff] (!%p787_p3) }
 0x25e   : > { %1020 = vmatprep.subr.bf16.mxu0 (!%p787_p3), %v1019_v1  ;;  %v1031_v9 = vpack.c.bf16 (!%p787_p3), %v560_v8, %v559_v7  ;;  %v562_v11 = vld [vmem:[#allocation8 + $0x48] sm:$0xff] (!%p787_p3)  ;;  %v563_v13 = vld [vmem:[#allocation8 + $0x50] sm:$0xff] (!%p787_p3)  ;;  %v564_v14 = vld [vmem:[#allocation8 + $0x58] sm:$0xff] (!%p787_p3) }
 0x25f   : > { %1022 = vmatpush3.bf16.msra.mxu0 (!%p787_p3), %v1019_v1  ;;  %v1035_v12 = vpack.c.bf16 (!%p787_p3), %v562_v11, %v561_v10  ;;  %v1039_v15 = vpack.c.bf16 (!%p787_p3), %v564_v14, %v563_v13  ;;  %v565_v16 = vld [vmem:[#allocation8 + $0x60] sm:$0xff] (!%p787_p3)  ;;  %v566_v17 = vld [vmem:[#allocation8 + $0x68] sm:$0xff] (!%p787_p3)  ;;  %v567_v19 = vld [vmem:[#allocation8 + $0x70] sm:$0xff] (!%p787_p3) }
 0x260   : > { %1024 = vmatprep.subr.bf16.mxu0 (!%p787_p3), %v1023_v3  ;;  %v1043_v18 = vpack.c.bf16 (!%p787_p3), %v566_v17, %v565_v16  ;;  %v568_v20 = vld [vmem:[#allocation8 + $0x78] sm:$0xff] (!%p787_p3)  ;;  %v788_v22 = vld [vmem:[%s1681_s6] ss:$0 sm:$0xff] (!%p787_p3) }
 0x261   : > { %v1047_v21 = vpack.c.bf16 (!%p787_p3), %v568_v20, %v567_v19 }
 0x263   : > { %1026 = vmatpush3.bf16.msra.mxu0 %v1023_v3 }
 0x264   : > { %1028 = vmatprep.subr.bf16.mxu0 %v1027_v6 }
 0x267   : > { %1030 = vmatpush3.bf16.msra.mxu0 %v1027_v6 }
 0x268   : > { %1032 = vmatprep.subr.bf16.mxu0 %v1031_v9 }
 0x26b   : > { %1034 = vmatpush3.bf16.msra.mxu0 %v1031_v9 }
 0x26c   : > { %1036 = vmatprep.subr.bf16.mxu0 %v1035_v12 }
 0x26f   : > { %1038 = vmatpush3.bf16.msra.mxu0 %v1035_v12 }
 0x270   : > { %1040 = vmatprep.subr.bf16.mxu0 %v1039_v15 }
 0x273   : > { %1042 = vmatpush3.bf16.msra.mxu0 %v1039_v15 }
 0x274   : > { %1044 = vmatprep.subr.bf16.mxu0 %v1043_v18 }
 0x277   : > { %1046 = vmatpush3.bf16.msra.mxu0 %v1043_v18 }
 0x278   : > { %1048 = vmatprep.subr.bf16.mxu0 %v1047_v21 }
 0x27b   : > { %1050 = vmatpush3.bf16.msra.mxu0 %v1047_v21 }
 0x27e   : > { %953 = vmatmul.mubr.f32.vlgmr.msra.gmra.mrb[0].mxu0 %v444_v31 }
 0x351   : > { %v954_v23 = vpop.f32.mrb[0].mxu0 }
 0x352   : > { %v648_v24 = vadd.f32 %v954_v23, %v788_v22  ;;  %v642_v25 = vpop.f32.mrb[1].mxu0 }
 0x353   : > { %v643_v26 = vadd.f32 %v788_v22, %v642_v25 }
 0x354   : > { %652 = vst [vmem:[%s1606_s13 + $0x8] sm:$0xff] %v648_v24 }
 0x355   : > { %651 = vst [vmem:[%s1606_s13] sm:$0xff] %v643_v26 }
 0x356 PF: > { %s795_s20 = sshll.u32 %s1392_s28, 8  ;;  %s667_s23 = sshll.u32 %s1606_s13, 4  ;;  %s1631_s23 = int_to_ptr.vmem [resolvable:$true] %s667_s23 }
 0x357   : > { %s1628_s29 = scalar_lea.hbm %s1682_s7, %s795_s20  ;;  %s654_s11 = scalar_lea.sflag [#allocation4], %s1576_s17 }
 0x358   : > { %s1246_s8 = scalar_lea.vmem %s1631_s23, 256  ;;  %s1328_s30 = smov [#allocation10]  }
 0x359   : > { %p1247_p7 = scmp.ne.s32.totalorder %s1631_s23, %s1246_s8  ;;  %s1250_s9 = sshll.u32 %s1328_s30, 4  ;;  %s1251_s9 = int_to_ptr.vmem [resolvable:$false] %s1250_s9 }
 0x35a   : > { %s1252_s28 = scalar_lea.vmem %s1251_s9, 512  ;;  %p1253_p2 = scmp.lt.s32.totalorder %s1631_s23, %s1251_s9 }
 0x35b   : > { %p1248_p12 = pnand %p1247_p7, %p1525_p5  ;;  %p1254_p4 = scmp.lt.s32.totalorder %s1252_s28, %s1246_s8 }
 0x35d   : > { %p1249_p1 = pneg %p1248_p12  ;;  %p1255_p9 = por %p1254_p4, %p1253_p2 }
 0x35f   : > { %p1256_p0 = pnand %p1255_p9, %p1249_p1 }
 0x361   : > { %1259 = shalt.err (!%p1256_p0)
}
 0x362   : > { %s1260_s13 = scalar_lea.hbm %s1628_s29, 256  ;;  %s1264_s14 = scalar_lea.hbm %s1682_s7, 512 }
 0x363   : > { %p1261_p11 = scmp.ne.s32.totalorder %s1628_s29, %s1260_s13  ;;  %p1265_p6 = scmp.lt.u32.totalorder %s1628_s29, %s1682_s7 }
 0x364   : > { %p1266_p10 = scmp.lt.u32.totalorder %s1264_s14, %s1260_s13  ;;  %p1268_p7 = scmp.lt.u32.totalorder %s1260_s13, %s1628_s29 }
 0x365   : > { %p1262_p8 = pnand %p1261_p11, %p1525_p5 }
 0x366   : > { %p1267_p3 = por %p1266_p10, %p1265_p6 }
 0x367   : > { %p1263_p13 = pneg %p1262_p8 }
 0x368   : > { %p1269_p12 = por %p1268_p7, %p1267_p3 }
 0x36a   : > { %p1270_p1 = pnand %p1269_p12, %p1263_p13 }
 0x36c   : > { %1273 = shalt.err (!%p1270_p1)
}
 0x36d   : > { %s1329_s21 = smov 128   ;;  %s1330_s16 = smov 8  }
 0x36e   : > { %1065 = dma.vmem_to_hbm [thread:$0]  (%p1525_p5), %s1631_s23, 256, %s1628_s29, %s654_s11, %s1329_s21, %s1329_s21, %s1330_s16  }
 0x36f PF: > { %s1702_s8 = sld [smem:[#allocation15_spill]]  ;;  %s682_s30 = sand.u32 1, %s1308_s24  }
 0x370   : > { %p1704_p4 = scmp.ge.s32.totalorder %s1320_s27, 2  ;;  %s683_s9 = scalar_lea.sflag [#allocation4], %s682_s30 }
 0x375   : > { %p1703_p2 = scmp.ne.s32.totalorder %s1702_s8, 0 }
 0x377   : > { %p1082_p9 = pnand %p1704_p4, %p1703_p2 }
 0x379   : > { %1303 = dma.done.wait (!%p1082_p9), %s683_s9, 256  }
 0x37a   : > { %1305 = vsyncadd (!%p1082_p9), %s683_s9, 4294967040  ;;  %p22_p0 = scmp.ge.s32.totalorder %s1511_s22, 4   ;;  %s1705_s24 = smov %s1312_s25 }
 0x37b   : > { %s1706_s25 = smov %s1316_s26  ;;  %s1707_s26 = smov %s1521_s18 }
 0x37c   : > { %s1708_s27 = smov %s1511_s22  ;;  %24 = sbr.rel (!%p22_p0) target bundleno = 7 (0x7), region = 113 }
 0x383   :  { %688 = vsyncpa [#allocation3], 1 }
 0x384   :  { %690 = vsyncpa [#allocation3 + $0x1], 1 }
 0x385   :  { %691 = vsyncpa [#allocation6], 1 }
 0x386   :  { %692 = vsyncpa [#allocation9], 1 }
 0x387   :  { %693 = vsyncpa [#allocation4], 1 }
 0x388   :  { %695 = vsyncpa [#allocation4 + $0x1], 1 }

</bundles_post_ra>
